<compile_context>
chip_gen: v6e
topology: v6e:2x2x1
jax: 0.10.0
libtpu: 0.0.40
codegen_flags: <defaults>
</compile_context>

<pallas_src>
import jax
import jax.numpy as jnp
from jax.experimental import pallas as pl
from jax.experimental.pallas import tpu as pltpu


def _round_up(x, m):
    return (x + m - 1) // m * m


def _choose_patch_tile(num_patches, dp, ep, cb, pb, ob, vmem_budget_bytes):
    """Largest MXU/pipeline-friendly patch tile that fits the VMEM budget.

    Footprint counts double-buffered patches / pos+bias / output tiles plus the
    (double-buffered) resident weight block.
    """
    def footprint(t):
        return (2 * t * dp * cb          # patch tile   (x2 pipeline buffers)
                + 2 * t * ep * pb        # pos+bias tile
                + 2 * t * ep * ob        # output tile
                + 2 * dp * ep * cb)      # weight (constant index_map)

    cap = _round_up(num_patches, 8)
    for t in (1024, 512, 256, 128):
        if t <= cap and footprint(t) <= vmem_budget_bytes:
            return t
    # Small-P fallback: one sublane-aligned tile along the patch axis.
    return min(cap, 128)


def _patch_embed_kernel(patches_ref, w_ref, posb_ref, out_ref):
    # patches_ref: (1, TP, Dp)   w_ref: (Dp, Ep)   posb_ref: (TP, Ep)
    # out_ref:     (1, TP, Ep)
    proj = jnp.dot(patches_ref[0], w_ref[...],
                   preferred_element_type=jnp.float32)        # (TP, Ep) f32 acc
    # posb may be bf16; the add promotes to f32 against the accumulator.
    out_ref[0, :, :] = (proj + posb_ref[...]).astype(out_ref.dtype)


def patch_embedding_forward(x, weight, bias, pos_embed, cls_token, patch_size,
                            *, compute_dtype=None):
    """x: [B, C, H, W] (NCHW, like the torch module).

    weight:    [n_embd, patch_dim]        (torch nn.Linear convention)
    bias:      [n_embd]
    pos_embed: [num_patches + 1, n_embd]
    cls_token: [n_embd]
    compute_dtype: dtype for the MXU operands and the pos+bias side stream.
        bf16 is recommended on all of v5e / v6e / v7x (the MXUs are natively
        bf16; f32 operands cost multiple passes). Accumulation and the epilogue
        add stay f32; the output keeps x.dtype.
    """
    B, C, H, W = x.shape
    p1, p2 = patch_size
    assert H % p1 == 0 and W % p2 == 0, "H/W must be divisible by patch size"
    gh, gw = H // p1, W // p2
    P = gh * gw                       # num_patches
    D = C * p1 * p2                   # patch_dim
    E = weight.shape[0]               # n_embd
    out_dtype = x.dtype
    if compute_dtype is None:
        compute_dtype = x.dtype

    # Pad contraction (D) and output (E) dims to multiples of 256 (v6e/v7x MXU
    # width; zero-padding is exact) so every load and the output store is
    # lane-dense.
    Dp = _round_up(D, 256)
    Ep = _round_up(E, 256)

    cb = jnp.dtype(compute_dtype).itemsize
    ob = jnp.dtype(out_dtype).itemsize
    pb = cb                                      # pos+bias stored in compute_dtype

    # Explicit VMEM budget: 24 MiB of tile buffers under a 32 MiB scoped limit
    # keeps headroom on v7x (64 MiB physical) while allowing 1024-row tiles on
    # v5e/v6e for typical ViT dims.
    vmem_budget = 24 * 1024 * 1024
    tp = _choose_patch_tile(P, Dp, Ep, cb, pb, ob, vmem_budget)
    Pp = _round_up(P, tp)

    # Cast BEFORE the out-of-kernel NCHW->patch rearrange (a full HBM->HBM
    # strided copy) so the bf16 path moves half the bytes.
    # TODO(synk): fusing this rearrange into the kernel (grid over (B, gh) with
    # an x BlockSpec of (1, C, p1, W) and an in-kernel flatten, or
    # memory_space=pl.ANY + manual strided DMA) would remove an entire
    # read+write of the patches tensor from HBM; needs profiling since
    # p2 << 128 makes the in-kernel flatten cost XLU/relayout work.
    xc = x.astype(compute_dtype)
    patches = xc.reshape(B, C, gh, p1, gw, p2).transpose(0, 2, 4, 1, 3, 5)
    patches = patches.reshape(B, P, D)
    if Pp != P or Dp != D:
        patches = jnp.pad(patches, ((0, 0), (0, Pp - P), (0, Dp - D)))

    w_t = weight.T.astype(compute_dtype)                       # (D, E)
    if Dp != D or Ep != E:
        w_t = jnp.pad(w_t, ((0, Dp - D), (0, Ep - E)))

    # Fold the linear bias into the patch rows of pos_embed once (f32 math),
    # then store the side stream in compute_dtype (halved DMA/VMEM on bf16).
    pos0 = pos_embed[0]                                        # (E,) cls-row pos
    posb = (pos_embed[1:].astype(jnp.float32)
            + bias.astype(jnp.float32)[None, :]).astype(compute_dtype)  # (P, E)
    if Pp != P or Ep != E:
        posb = jnp.pad(posb, ((0, Pp - P), (0, Ep - E)))

    # Grid: patch tiles outer, batch innermost -> posb block index is constant
    # across the inner axis, so its tile is DMA'd once per patch tile.
    grid = (Pp // tp, B)

    out = pl.pallas_call(
        _patch_embed_kernel,
        out_shape=jax.ShapeDtypeStruct((B, Pp, Ep), out_dtype),
        grid_spec=pltpu.PrefetchScalarGridSpec(
            num_scalar_prefetch=0,
            grid=grid,
            in_specs=[
                pl.BlockSpec((1, tp, Dp), lambda i, b: (b, i, 0)),
                # TODO(synk): pipeline_mode=pl.Buffered(1) on this constant-
                # index weight block would drop its second VMEM buffer.
                pl.BlockSpec((Dp, Ep), lambda i, b: (0, 0)),    # weight resident
                pl.BlockSpec((tp, Ep), lambda i, b: (i, 0)),    # pos+bias tile
            ],
            out_specs=pl.BlockSpec((1, tp, Ep), lambda i, b: (b, i, 0)),
        ),
        compiler_params=pltpu.CompilerParams(
            dimension_semantics=("parallel", "parallel"),
            vmem_limit_bytes=32 * 1024 * 1024),
    )(patches, w_t, posb)

    if Pp != P or Ep != E:
        out = out[:, :P, :E]

    # cls row (+ its positional embedding) prepended in the wrapper so the
    # kernel's store stays (8,128)-aligned. For real configs (E a multiple of
    # 256, P a multiple of the tile) the slice above is a no-op and XLA fuses
    # slice + concat into a single output pass.
    cls_row = (cls_token.astype(jnp.float32)
               + pos0.astype(jnp.float32)).astype(out_dtype)   # (E,)
    cls_rows = jnp.broadcast_to(cls_row, (B, 1, E))
    return jnp.concatenate([cls_rows, out], axis=1)            # (B, P+1, E)


if __name__ == "__main__":
    # Small config consistent with the module:
    # img_size=16, patch_size=4, num_channels=4, n_embd=32,
    # patch_embed_bias=True, learned_pos_embedding=True
    B, C, H, W = 2, 4, 16, 16
    p1 = p2 = 4
    gh, gw = H // p1, W // p2
    num_patches = gh * gw                 # 16
    patch_dim = C * p1 * p2               # 64
    n_embd = 32

    key = jax.random.PRNGKey(0)
    kx, kw, kb, kp = jax.random.split(key, 4)

    x = jax.random.normal(kx, (B, C, H, W), dtype=jnp.float32)

    # Deterministic parameter init (synthetic; mirrors module __init__ shapes)
    weight = jax.random.normal(kw, (n_embd, patch_dim), dtype=jnp.float32) * 0.02
    bias = jax.random.normal(kb, (n_embd,), dtype=jnp.float32) * 0.02
    pos_embed = jax.random.normal(kp, (num_patches + 1, n_embd), dtype=jnp.float32) * 0.02
    cls_token = jnp.zeros((n_embd,), dtype=jnp.float32)   # nn.Parameter(torch.zeros(...))

    # Pure-JAX reference (mirrors the torch forward)
    patches = x.reshape(B, C, gh, p1, gw, p2).transpose(0, 2, 4, 1, 3, 5).reshape(
        B, num_patches, patch_dim)
    ref = patches @ weight.T + bias
    ref = jnp.concatenate(
        [jnp.broadcast_to(cls_token, (B, 1, n_embd)), ref], axis=1)
    ref = ref + pos_embed[None]

    # f32 MXU path (tight tolerance)
    out_f32 = patch_embedding_forward(x, weight, bias, pos_embed, cls_token, (p1, p2))
    out_f32 = jax.block_until_ready(out_f32)
    assert out_f32.shape == (B, num_patches + 1, n_embd)
    assert jnp.allclose(out_f32, ref, atol=1e-4, rtol=1e-4)

    # bf16 MXU-operand path (recommended on v5e/v6e/v7x; looser tolerance)
    out_bf16 = patch_embedding_forward(x, weight, bias, pos_embed, cls_token, (p1, p2),
                                       compute_dtype=jnp.bfloat16)
    out_bf16 = jax.block_until_ready(out_bf16)
    assert out_bf16.shape == (B, num_patches + 1, n_embd)
    assert jnp.allclose(out_bf16, ref, atol=2e-2, rtol=2e-2)

    print("KERNEL_OK")
</pallas_src>

<mosaic_0001>
module attributes {stable_mosaic.version = 11 : i64} {
  func.func @_patch_embed_kernel(%arg0: i32, %arg1: i32, %arg2: memref<1x16x256xf32, #tpu.memory_space<vmem>>, %arg3: memref<256x256xf32, #tpu.memory_space<vmem>>, %arg4: memref<16x256xf32, #tpu.memory_space<vmem>>, %arg5: memref<1x16x256xf32, #tpu.memory_space<vmem>>) attributes {dimension_semantics = [#tpu.dimension_semantics<parallel>, #tpu.dimension_semantics<parallel>], iteration_bounds = array<i64: 1, 2>, scalar_prefetch = 0 : i64, scratch_operands = 0 : i64, tpu.core_type = #tpu.core_type<tc>, window_params = [{transform_indices = @transform_0, window_bounds = array<i64: 1, 16, 256>}, {pipeline_mode = #tpu.pipeline_mode<synchronous>, transform_indices = @transform_1, window_bounds = array<i64: 256, 256>}, {transform_indices = @transform_2, window_bounds = array<i64: 16, 256>}, {transform_indices = @transform_3, window_bounds = array<i64: 1, 16, 256>}]} {
    %c0 = arith.constant 0 : index
    %c0_0 = arith.constant 0 : index
    %c0_1 = arith.constant 0 : index
    %0 = vector.load %arg2[%c0, %c0_0, %c0_1] : memref<1x16x256xf32, #tpu.memory_space<vmem>>, vector<1x16x256xf32>
    %1 = vector.shape_cast %0 : vector<1x16x256xf32> to vector<16x256xf32>
    %c0_2 = arith.constant 0 : index
    %c0_3 = arith.constant 0 : index
    %2 = vector.load %arg3[%c0_2, %c0_3] : memref<256x256xf32, #tpu.memory_space<vmem>>, vector<256x256xf32>
    %cst = arith.constant dense<0.000000e+00> : vector<16x256xf32>
    %3 = tpu.matmul %1, %2, %cst {dimension_numbers = #tpu.dot_dimension_numbers<[1], [0], [0], [1], [0, 0, 1, 1], [], []>} : vector<16x256xf32>, vector<256x256xf32>, vector<16x256xf32> -> vector<16x256xf32>
    %c0_4 = arith.constant 0 : index
    %c0_5 = arith.constant 0 : index
    %4 = vector.load %arg4[%c0_4, %c0_5] : memref<16x256xf32, #tpu.memory_space<vmem>>, vector<16x256xf32>
    %5 = arith.addf %3, %4 : vector<16x256xf32>
    %c0_6 = arith.constant 0 : index
    %c0_7 = arith.constant 0 : index
    %c0_8 = arith.constant 0 : index
    %6 = vector.load %arg5[%c0_6, %c0_7, %c0_8] : memref<1x16x256xf32, #tpu.memory_space<vmem>>, vector<1x16x256xf32>
    %7 = vector.shape_cast %6 : vector<1x16x256xf32> to vector<16x256xf32>
    %8 = vector.shape_cast %5 : vector<16x256xf32> to vector<1x16x256xf32>
    tpu.vector_store %arg5[%c0_6, %c0_7, %c0_8], %8 {strides = array<i32>} : memref<1x16x256xf32, #tpu.memory_space<vmem>>, vector<1x16x256xf32>,
    return
  }
  func.func @transform_0(%arg0: i32, %arg1: i32) -> (i32, i32, i32) {
    %c0_i32 = arith.constant 0 : i32
    %c0_i32_0 = arith.constant 0 : i32
    return %arg1, %arg0, %c0_i32 : i32, i32, i32
  }
  func.func @transform_1(%arg0: i32, %arg1: i32) -> (i32, i32) {
    %c0_i32 = arith.constant 0 : i32
    %c0_i32_0 = arith.constant 0 : i32
    %c0_i32_1 = arith.constant 0 : i32
    return %c0_i32, %c0_i32_0 : i32, i32
  }
  func.func @transform_2(%arg0: i32, %arg1: i32) -> (i32, i32) {
    %c0_i32 = arith.constant 0 : i32
    %c0_i32_0 = arith.constant 0 : i32
    return %arg0, %c0_i32 : i32, i32
  }
  func.func @transform_3(%arg0: i32, %arg1: i32) -> (i32, i32, i32) {
    %c0_i32 = arith.constant 0 : i32
    %c0_i32_0 = arith.constant 0 : i32
    return %arg1, %arg0, %c0_i32 : i32, i32, i32
  }
}

</mosaic_0001>

<bundles_post_ra>
// kernel: tpu_custom_call.1
= control target key start
LH: loop header
LB: loop body
LE: loop exit
PB: predicated region body
PF: predicated region fallthrough
CT: control target
= control target key end

     0   :  { %8 = vsyncpa [#allocation3], 0  ;;  %s1100_s0 = inlined_call_operand.hbm [shape: f32[2,16,256], index: 0, kind: input, shape index: {}]   ;;  %s1101_s1 = inlined_call_operand.hbm [shape: f32[256,256], index: 1, kind: input, shape index: {}]   ;;  %s1102_s2 = inlined_call_operand.hbm [shape: f32[16,256], index: 2, kind: input, shape index: {}]   ;;  %s1103_s3 = inlined_call_operand.hbm [shape: f32[2,16,256], index: 3, kind: output, shape index: {}]  }
   0x1   :  { %10 = vsyncpa [#allocation3 + $0x1], 0 }
   0x2   :  { %11 = vsyncpa [#allocation6], 0 }
   0x3   :  { %12 = vsyncpa [#allocation4], 0 }
   0x4   :  { %14 = vsyncpa [#allocation4 + $0x1], 0  ;;  %s893_s12 = smov 0   ;;  %s895_s13 = smov 0  }
   0x5   :  { %s897_s14 = smov 0   ;;  %s899_s15 = smov 0  }
   0x6   :  { %s901_s16 = smov 0   ;;  %s903_s17 = smov 0  }
   0x7 LB: > { %s527_s18 = sadd.s32 4294967295, %s863_s17   ;;  %s528_s19 = sadd.s32 4294967294, %s863_s17   ;;  %s863_s17 = sphi %s903_s17, %s20_s17   ;;  %s859_s16 = sphi %s901_s16, %s1120_s16   ;;  %s855_s15 = sphi %s899_s15, %s1119_s15   ;;  %s851_s14 = sphi %s897_s14, %s1118_s14   ;;  %s847_s13 = sphi %s895_s13, %s1117_s13   ;;  %s843_s12 = sphi %s893_s12, %s1116_s12  }
   0x8   : > { %p54_p0 = scmp.ne.s32.totalorder %s847_s13, %s843_s12  ;;  %p927_p1 = scmp.eq.s32.totalorder %s527_s18, 0 }
   0x9   : > { %p931_p2 = scmp.eq.s32.totalorder %s527_s18, 1  ;;  %p133_p3 = scmp.eq.s32.totalorder %s528_s19, 1 }
   0xa   : > { %p937_p4 = por %p927_p1, %p54_p0  ;;  %p529_p5 = scmp.ge.s32.totalorder %s863_s17, 1 }
   0xb   : > { %p942_p6 = por %p133_p3, %p54_p0  ;;  %p140_p7 = scmp.lt.s32.totalorder %s863_s17, 3 }
   0xc   : > { %s865_s25 = smov [#allocation5]   ;;  %s866_s28 = smov [#allocation7]  }
   0xd   : > { %s1108_s23 = scalar_select %p942_p6, 1, 0 }
   0xe   : > { %p947_p8 = pnand %p529_p5, %p140_p7  ;;  %s152_s26 = sshll.u32 %s865_s25, 4  ;;  %s153_s26 = int_to_ptr.vmem [resolvable:$true] %s152_s26 }
   0xf   : > { %s169_s29 = sshll.u32 %s866_s28, 4  ;;  %s710_s30 = scalar_lea.vmem %s153_s26, 8192  ;;  %s170_s29 = int_to_ptr.vmem [resolvable:$true] %s169_s29 }
  0x10   : > { %p624_p9 = pneg %p947_p8  ;;  %p711_p13 = scmp.ne.s32.totalorder %s153_s26, %s710_s30 }
  0x11   : > { %p718_p5 = scmp.lt.s32.totalorder %s153_s26, %s153_s26  ;;  %p719_p7 = scmp.lt.s32.totalorder %s710_s30, %s710_s30 }
  0x12   : > { %p956_p11 = pnand %p624_p9, %p927_p1 }
  0x13   : > { %p720_p10 = por %p719_p7, %p718_p5 }
  0x14   : > { %p701_p12 = pneg %p956_p11 }
  0x16   : > { %p713_p0 = pnand %p711_p13, %p701_p12 }
  0x18   : > { %p714_p3 = pneg %p713_p0 }
  0x1a   : > { %p721_p9 = pnand %p720_p10, %p714_p3 }
  0x1c   : > { %724 = shalt.err (!%p721_p9)
}
  0x1d   : > { %s1104_s4 = smov 256   ;;  %s868_s5 = smov 16  }
  0x1e   : > { %627 = dma.hbm_to_vmem [thread:$0]  (!%p956_p11), %s1101_s1, 8192, %s153_s26, [#allocation6], %s1104_s4, %s1104_s4, %s868_s5  }
  0x1f   : > { %s736_s8 = scalar_lea.vmem %s170_s29, 512  ;;  %p744_p10 = scmp.lt.s32.totalorder %s170_s29, %s170_s29 }
  0x20   : > { %p737_p13 = scmp.ne.s32.totalorder %s170_s29, %s736_s8  ;;  %p745_p3 = scmp.lt.s32.totalorder %s736_s8, %s736_s8 }
  0x22   : > { %p739_p0 = pnand %p737_p13, %p701_p12  ;;  %p746_p7 = por %p745_p3, %p744_p10 }
  0x24   : > { %p740_p5 = pneg %p739_p0 }
  0x26   : > { %p747_p9 = pnand %p746_p7, %p740_p5 }
  0x28   : > { %750 = shalt.err (!%p747_p9)
}
  0x29   : > { %630 = dma.hbm_to_vmem [thread:$0]  (!%p956_p11), %s1102_s2, 512, %s170_s29, [#allocation6], %s1104_s4, %s1104_s4, %s868_s5  }
  0x2a   : > { %s29_s11 = sadd.s32 1, %s859_s16  ;;  %s41_s18 = sadd.s32 1, %s851_s14 }
  0x2b   : > { %p30_p12 = scmp.ge.s32.totalorder %s29_s11, 2  ;;  %p48_p13 = scmp.ne.s32.totalorder %s851_s14, %s847_s13 }
  0x2c   : > { %p49_p0 = scmp.eq.s32.totalorder %s863_s17, 0  ;;  %p641_p5 = scmp.lt.s32.totalorder %s863_s17, 2 }
  0x2d   : > { %s1122_s11 = smov (%p30_p12, %s29_s11), 0  ;;  %p994_p3 = por %p931_p2, %p48_p13 }
  0x2e   : > { %p50_p10 = por %p49_p0, %p48_p13  ;;  %s36_s25 = ssub.s32 %s859_s16, %s1122_s11 }
  0x2f   : > { %s183_s26 = sand.u32 1, %s851_s14   ;;  %p39_p7 = scmp.eq.s32.totalorder %s36_s25, 0 }
  0x30   : > { %s533_s27 = sshll.u32 %s183_s26, 5  ;;  %s546_s28 = sshll.u32 %s859_s16, 9 }
  0x31   : > { %s1003_s29 = scalar_select %p39_p7, %s851_s14, %s41_s18  }
  0x32   : > { %s196_s7 = scalar_lea.hbm %s1100_s0, %s546_s28  ;;  %s187_s8 = scalar_lea.vmem [#allocation2], %s533_s27 }
  0x33   : > { %s197_s9 = sshll.u32 %s187_s8, 4  ;;  %p1010_p11 = pnand %p641_p5, %p50_p10  ;;  %s198_s9 = int_to_ptr.vmem [resolvable:$true] %s197_s9 }
  0x34   : > { %s184_s10 = scalar_lea.sflag [#allocation3], %s183_s26  ;;  %s764_s25 = scalar_lea.vmem %s198_s9, 512 }
  0x35   : > { %p753_p2 = pneg %p1010_p11  ;;  %p765_p9 = scmp.ne.s32.totalorder %s198_s9, %s764_s25 }
  0x36   : > { %s869_s18 = smov [#allocation2]  }
  0x37   : > { %p767_p12 = pnand %p765_p9, %p753_p2  ;;  %s769_s4 = sshll.u32 %s869_s18, 4  ;;  %s770_s4 = int_to_ptr.vmem [resolvable:$false] %s769_s4 }
  0x38   : > { %s771_s28 = scalar_lea.vmem %s770_s4, 1024  ;;  %p772_p0 = scmp.lt.s32.totalorder %s198_s9, %s770_s4 }
  0x39   : > { %p768_p13 = pneg %p767_p12  ;;  %p773_p7 = scmp.lt.s32.totalorder %s771_s28, %s764_s25 }
  0x3b   : > { %p774_p6 = por %p773_p7, %p772_p0 }
  0x3d   : > { %p775_p5 = pnand %p774_p6, %p768_p13 }
  0x3f   : > { %778 = shalt.err (!%p775_p5)
}
  0x40   : > { %s1113_s27 = smov 256   ;;  %209 = sbr.rel (%p947_p8) target bundleno = 349 (0x15d), region = 32 }
  0x41   : > { %634 = dma.hbm_to_vmem [thread:$0]  (!%p1010_p11), %s196_s7, 512, %s198_s9, %s184_s10, %s1113_s27, %s1113_s27, %s868_s5  }
  0x42   : > { %s1024_s26 = sand.u32 (!%p947_p8), 1, %s847_s13  }
  0x43   : > { %s537_s4 = sshll.u32 (!%p947_p8), %s1024_s26, 5  ;;  %s212_s30 = scalar_lea.sflag (!%p947_p8), [#allocation3], %s1024_s26 }
  0x44   : > { %s1030_s6 = scalar_lea.vmem (!%p947_p8), [#allocation2], %s537_s4 }
  0x45   : > { %830 = dma.done.wait (%p937_p4), %s212_s30, 512  }
  0x46   : > { %832 = vsyncadd (%p937_p4), %s212_s30, 4294966784 }
  0x47   : > { %834 = dma.done.wait (%p927_p1), [#allocation6], 8704  }
  0x48   : > { %836 = vsyncadd (%p927_p1), [#allocation6], 4294958592  ;;  %v284_v0 = vld [vmem:[#allocation5 + $0xf8] sm:$0xff]  ;;  %v283_v1 = vld [vmem:[#allocation5 + $0xf0] sm:$0xff]  ;;  %s245_s20 = scalar_lea.vmem [#allocation8], %s537_s4  ;;  %s547_s24 = sshll.u32 %s855_s15, 9 }
  0x49   : > { %v282_v2 = vld [vmem:[#allocation5 + $0xe8] sm:$0xff]  ;;  %321 = vmatprep.subr.mxu0 %v284_v0  ;;  %548 = vmatprep.subr.mxu1 %v284_v0  ;;  %v281_v3 = vld [vmem:[#allocation5 + $0xe0] sm:$0xff]  ;;  %v280_v4 = vld [vmem:[#allocation5 + $0xd8] sm:$0xff]  ;;  %s419_s22 = sshll.u32 %s245_s20, 4  ;;  %s1052_s8 = scalar_lea.hbm %s1103_s3, %s547_s24  ;;  %s1047_s22 = int_to_ptr.vmem [resolvable:$true] %s419_s22 }
  0x4a   : > { %322 = vmatpush1.msra.mxu0 %v283_v1  ;;  %580 = vmatpush1.msra.mxu1 %v283_v1  ;;  %v279_v5 = vld [vmem:[#allocation5 + $0xd0] sm:$0xff]  ;;  %v278_v6 = vld [vmem:[#allocation5 + $0xc8] sm:$0xff]  ;;  %v277_v7 = vld [vmem:[#allocation5 + $0xc0] sm:$0xff]  ;;  %s403_s15 = scalar_lea.sflag [#allocation4], %s1024_s26  ;;  %s779_s9 = scalar_lea.vmem %s1047_s22, 512 }
  0x4b   : > { %323 = vmatprep.subr.mxu0 %v282_v2  ;;  %549 = vmatprep.subr.mxu1 %v282_v2  ;;  %v276_v8 = vld [vmem:[#allocation5 + $0xb8] sm:$0xff]  ;;  %v275_v9 = vld [vmem:[#allocation5 + $0xb0] sm:$0xff]  ;;  %v274_v10 = vld [vmem:[#allocation5 + $0xa8] sm:$0xff]  ;;  %p780_p1 = scmp.ne.s32.totalorder %s1047_s22, %s779_s9  ;;  %s870_s21 = smov [#allocation8]  }
  0x4c   : > { %324 = vmatpush1.msra.mxu0 %v281_v3  ;;  %581 = vmatpush1.msra.mxu1 %v281_v3  ;;  %v273_v11 = vld [vmem:[#allocation5 + $0xa0] sm:$0xff]  ;;  %v272_v12 = vld [vmem:[#allocation5 + $0x98] sm:$0xff]  ;;  %v271_v13 = vld [vmem:[#allocation5 + $0x90] sm:$0xff]  ;;  %s783_s10 = sshll.u32 %s870_s21, 4  ;;  %s784_s10 = int_to_ptr.vmem [resolvable:$false] %s783_s10 }
  0x4d   : > { %325 = vmatprep.subr.mxu0 %v280_v4  ;;  %550 = vmatprep.subr.mxu1 %v280_v4  ;;  %v270_v14 = vld [vmem:[#allocation5 + $0x88] sm:$0xff]  ;;  %v269_v15 = vld [vmem:[#allocation5 + $0x80] sm:$0xff]  ;;  %v268_v16 = vld [vmem:[#allocation5 + $0x78] sm:$0xff]  ;;  %p781_p4 = pnand %p780_p1, %p994_p3  ;;  %s785_s25 = scalar_lea.vmem %s784_s10, 1024 }
  0x4e   : > { %326 = vmatpush1.msra.mxu0 %v279_v5  ;;  %582 = vmatpush1.msra.mxu1 %v279_v5  ;;  %v267_v17 = vld [vmem:[#allocation5 + $0x70] sm:$0xff]  ;;  %v266_v18 = vld [vmem:[#allocation5 + $0x68] sm:$0xff]  ;;  %v265_v19 = vld [vmem:[#allocation5 + $0x60] sm:$0xff]  ;;  %p786_p8 = scmp.lt.s32.totalorder %s1047_s22, %s784_s10  ;;  %p787_p10 = scmp.lt.s32.totalorder %s785_s25, %s779_s9 }
  0x4f   : > { %327 = vmatprep.subr.mxu0 %v278_v6  ;;  %551 = vmatprep.subr.mxu1 %v278_v6  ;;  %v264_v20 = vld [vmem:[#allocation5 + $0x58] sm:$0xff]  ;;  %v263_v21 = vld [vmem:[#allocation5 + $0x50] sm:$0xff]  ;;  %v262_v22 = vld [vmem:[#allocation5 + $0x48] sm:$0xff]  ;;  %p782_p6 = pneg %p781_p4 }
  0x50   : > { %328 = vmatpush1.msra.mxu0 %v277_v7  ;;  %583 = vmatpush1.msra.mxu1 %v277_v7  ;;  %v261_v23 = vld [vmem:[#allocation5 + $0x40] sm:$0xff]  ;;  %v260_v24 = vld [vmem:[#allocation5 + $0x38] sm:$0xff]  ;;  %v259_v25 = vld [vmem:[#allocation5 + $0x30] sm:$0xff]  ;;  %p788_p11 = por %p787_p10, %p786_p8 }
  0x51   : > { %329 = vmatprep.subr.mxu0 %v276_v8  ;;  %552 = vmatprep.subr.mxu1 %v276_v8  ;;  %v258_v26 = vld [vmem:[#allocation5 + $0x28] sm:$0xff]  ;;  %v257_v27 = vld [vmem:[#allocation5 + $0x20] sm:$0xff]  ;;  %v256_v28 = vld [vmem:[#allocation5 + $0x18] sm:$0xff] }
  0x52   : > { %330 = vmatpush1.msra.mxu0 %v275_v9  ;;  %584 = vmatpush1.msra.mxu1 %v275_v9  ;;  %v255_v29 = vld [vmem:[#allocation5 + $0x10] sm:$0xff]  ;;  %v254_v30 = vld [vmem:[#allocation5 + $0x8] sm:$0xff]  ;;  %v253_v31 = vld [vmem:[#allocation5] sm:$0xff]  ;;  %p789_p2 = pnand %p788_p11, %p782_p6 }
  0x53   : > { %331 = vmatprep.subr.mxu0 %v274_v10  ;;  %553 = vmatprep.subr.mxu1 %v274_v10  ;;  %v316_v32 = vld [vmem:[#allocation5 + $0x1f8] sm:$0xff]  ;;  %v315_v33 = vld [vmem:[#allocation5 + $0x1f0] sm:$0xff]  ;;  %v314_v34 = vld [vmem:[#allocation5 + $0x1e8] sm:$0xff] }
  0x54   : > { %332 = vmatpush1.msra.mxu0 %v273_v11  ;;  %585 = vmatpush1.msra.mxu1 %v273_v11  ;;  %v313_v35 = vld [vmem:[#allocation5 + $0x1e0] sm:$0xff]  ;;  %v312_v36 = vld [vmem:[#allocation5 + $0x1d8] sm:$0xff]  ;;  %v311_v37 = vld [vmem:[#allocation5 + $0x1d0] sm:$0xff] }
  0x55   : > { %333 = vmatprep.subr.mxu0 %v272_v12  ;;  %554 = vmatprep.subr.mxu1 %v272_v12  ;;  %v310_v38 = vld [vmem:[#allocation5 + $0x1c8] sm:$0xff]  ;;  %v309_v39 = vld [vmem:[#allocation5 + $0x1c0] sm:$0xff]  ;;  %v308_v40 = vld [vmem:[#allocation5 + $0x1b8] sm:$0xff] }
  0x56   : > { %334 = vmatpush1.msra.mxu0 %v271_v13  ;;  %586 = vmatpush1.msra.mxu1 %v271_v13  ;;  %v307_v41 = vld [vmem:[#allocation5 + $0x1b0] sm:$0xff]  ;;  %v306_v42 = vld [vmem:[#allocation5 + $0x1a8] sm:$0xff]  ;;  %v305_v43 = vld [vmem:[#allocation5 + $0x1a0] sm:$0xff] }
  0x57   : > { %335 = vmatprep.subr.mxu0 %v270_v14  ;;  %555 = vmatprep.subr.mxu1 %v270_v14  ;;  %v304_v44 = vld [vmem:[#allocation5 + $0x198] sm:$0xff]  ;;  %v303_v45 = vld [vmem:[#allocation5 + $0x190] sm:$0xff]  ;;  %v302_v46 = vld [vmem:[#allocation5 + $0x188] sm:$0xff] }
  0x58   : > { %336 = vmatpush1.msra.mxu0 %v269_v15  ;;  %587 = vmatpush1.msra.mxu1 %v269_v15  ;;  %v301_v47 = vld [vmem:[#allocation5 + $0x180] sm:$0xff]  ;;  %v300_v48 = vld [vmem:[#allocation5 + $0x178] sm:$0xff]  ;;  %v299_v49 = vld [vmem:[#allocation5 + $0x170] sm:$0xff] }
  0x59   : > { %337 = vmatprep.subr.mxu0 %v268_v16  ;;  %556 = vmatprep.subr.mxu1 %v268_v16  ;;  %v298_v50 = vld [vmem:[#allocation5 + $0x168] sm:$0xff]  ;;  %v297_v51 = vld [vmem:[#allocation5 + $0x160] sm:$0xff]  ;;  %v296_v52 = vld [vmem:[#allocation5 + $0x158] sm:$0xff] }
  0x5a   : > { %338 = vmatpush1.msra.mxu0 %v267_v17  ;;  %588 = vmatpush1.msra.mxu1 %v267_v17  ;;  %v295_v53 = vld [vmem:[#allocation5 + $0x150] sm:$0xff]  ;;  %v294_v54 = vld [vmem:[#allocation5 + $0x148] sm:$0xff]  ;;  %v293_v55 = vld [vmem:[#allocation5 + $0x140] sm:$0xff] }
  0x5b   : > { %339 = vmatprep.subr.mxu0 %v266_v18  ;;  %557 = vmatprep.subr.mxu1 %v266_v18  ;;  %v292_v56 = vld [vmem:[#allocation5 + $0x138] sm:$0xff]  ;;  %v291_v57 = vld [vmem:[#allocation5 + $0x130] sm:$0xff]  ;;  %v290_v58 = vld [vmem:[#allocation5 + $0x128] sm:$0xff] }
  0x5c   : > { %340 = vmatpush1.msra.mxu0 %v265_v19  ;;  %589 = vmatpush1.msra.mxu1 %v265_v19  ;;  %v289_v59 = vld [vmem:[#allocation5 + $0x120] sm:$0xff]  ;;  %v288_v60 = vld [vmem:[#allocation5 + $0x118] sm:$0xff]  ;;  %v287_v61 = vld [vmem:[#allocation5 + $0x110] sm:$0xff] }
  0x5d   : > { %341 = vmatprep.subr.mxu0 %v264_v20  ;;  %558 = vmatprep.subr.mxu1 %v264_v20  ;;  %v286_v62 = vld [vmem:[#allocation5 + $0x108] sm:$0xff]  ;;  %v285_v63 = vld [vmem:[#allocation5 + $0x100] sm:$0xff]  ;;  %v252_v1 = vld [vmem:[%s1030_s6 + $0x18] sm:$0xff] }
  0x5e   : > { %342 = vmatpush1.msra.mxu0 %v263_v21  ;;  %590 = vmatpush1.msra.mxu1 %v263_v21  ;;  %v250_v0 = vld [vmem:[%s1030_s6 + $0x8] sm:$0xff]  ;;  %v249_v2 = vld [vmem:[%s1030_s6] sm:$0xff]  ;;  %v251_v3 = vld [vmem:[%s1030_s6 + $0x10] sm:$0xff] }
  0x5f   : > { %343 = vmatprep.subr.mxu0 %v262_v22  ;;  %559 = vmatprep.subr.mxu1 %v262_v22  ;;  %v317_v4 = vld [vmem:[#allocation7] sm:$0xff]  ;;  %v319_v5 = vld [vmem:[#allocation7 + $0x10] sm:$0xff]  ;;  %v318_v8 = vld [vmem:[#allocation7 + $0x8] sm:$0xff] }
  0x60   : > { %344 = vmatpush1.msra.mxu0 %v261_v23  ;;  %591 = vmatpush1.msra.mxu1 %v261_v23  ;;  %v320_v9 = vld [vmem:[#allocation7 + $0x18] sm:$0xff] }
  0x61   : > { %345 = vmatprep.subr.mxu0 %v260_v24  ;;  %560 = vmatprep.subr.mxu1 %v260_v24 }
  0x62   : > { %346 = vmatpush1.msra.mxu0 %v259_v25  ;;  %592 = vmatpush1.msra.mxu1 %v259_v25 }
  0x63   : > { %347 = vmatprep.subr.mxu0 %v258_v26  ;;  %561 = vmatprep.subr.mxu1 %v258_v26 }
  0x64   : > { %348 = vmatpush1.msra.mxu0 %v257_v27  ;;  %593 = vmatpush1.msra.mxu1 %v257_v27 }
  0x65   : > { %349 = vmatprep.subr.mxu0 %v256_v28  ;;  %562 = vmatprep.subr.mxu1 %v256_v28 }
  0x66   : > { %350 = vmatpush1.msra.mxu0 %v255_v29  ;;  %594 = vmatpush1.msra.mxu1 %v255_v29 }
  0x67   : > { %351 = vmatprep.subr.mxu0 %v254_v30  ;;  %563 = vmatprep.subr.mxu1 %v254_v30 }
  0x68   : > { %352 = vmatpush1.msra.mxu0 %v253_v31  ;;  %595 = vmatpush1.msra.mxu1 %v253_v31 }
  0x69   : > { %353 = vmatprep.subr.mxu0 %v316_v32  ;;  %564 = vmatprep.subr.mxu1 %v316_v32 }
  0x6a   : > { %354 = vmatpush2.msra.mxu0 %v315_v33  ;;  %596 = vmatpush2.msra.mxu1 %v315_v33 }
  0x6b   : > { %355 = vmatprep.subr.mxu0 %v314_v34  ;;  %565 = vmatprep.subr.mxu1 %v314_v34 }
  0x6c   : > { %356 = vmatpush2.msra.mxu0 %v313_v35  ;;  %597 = vmatpush2.msra.mxu1 %v313_v35 }
  0x6d   : > { %357 = vmatprep.subr.mxu0 %v312_v36  ;;  %566 = vmatprep.subr.mxu1 %v312_v36 }
  0x6e   : > { %358 = vmatpush2.msra.mxu0 %v311_v37  ;;  %598 = vmatpush2.msra.mxu1 %v311_v37 }
  0x6f   : > { %359 = vmatprep.subr.mxu0 %v310_v38  ;;  %567 = vmatprep.subr.mxu1 %v310_v38 }
  0x70   : > { %360 = vmatpush2.msra.mxu0 %v309_v39  ;;  %599 = vmatpush2.msra.mxu1 %v309_v39 }
  0x71   : > { %361 = vmatprep.subr.mxu0 %v308_v40  ;;  %568 = vmatprep.subr.mxu1 %v308_v40 }
  0x72   : > { %362 = vmatpush2.msra.mxu0 %v307_v41  ;;  %600 = vmatpush2.msra.mxu1 %v307_v41 }
  0x73   : > { %363 = vmatprep.subr.mxu0 %v306_v42  ;;  %569 = vmatprep.subr.mxu1 %v306_v42 }
  0x74   : > { %364 = vmatpush2.msra.mxu0 %v305_v43  ;;  %601 = vmatpush2.msra.mxu1 %v305_v43 }
  0x75   : > { %365 = vmatprep.subr.mxu0 %v304_v44  ;;  %570 = vmatprep.subr.mxu1 %v304_v44 }
  0x76   : > { %366 = vmatpush2.msra.mxu0 %v303_v45  ;;  %602 = vmatpush2.msra.mxu1 %v303_v45 }
  0x77   : > { %367 = vmatprep.subr.mxu0 %v302_v46  ;;  %571 = vmatprep.subr.mxu1 %v302_v46 }
  0x78   : > { %368 = vmatpush2.msra.mxu0 %v301_v47  ;;  %603 = vmatpush2.msra.mxu1 %v301_v47 }
  0x79   : > { %369 = vmatprep.subr.mxu0 %v300_v48  ;;  %572 = vmatprep.subr.mxu1 %v300_v48 }
  0x7a   : > { %370 = vmatpush2.msra.mxu0 %v299_v49  ;;  %604 = vmatpush2.msra.mxu1 %v299_v49 }
  0x7b   : > { %371 = vmatprep.subr.mxu0 %v298_v50  ;;  %573 = vmatprep.subr.mxu1 %v298_v50 }
  0x7c   : > { %372 = vmatpush2.msra.mxu0 %v297_v51  ;;  %605 = vmatpush2.msra.mxu1 %v297_v51 }
  0x7d   : > { %373 = vmatprep.subr.mxu0 %v296_v52  ;;  %574 = vmatprep.subr.mxu1 %v296_v52 }
  0x7e   : > { %374 = vmatpush2.msra.mxu0 %v295_v53  ;;  %606 = vmatpush2.msra.mxu1 %v295_v53 }
  0x7f   : > { %375 = vmatprep.subr.mxu0 %v294_v54  ;;  %575 = vmatprep.subr.mxu1 %v294_v54 }
  0x80   : > { %376 = vmatpush2.msra.mxu0 %v293_v55  ;;  %607 = vmatpush2.msra.mxu1 %v293_v55 }
  0x81   : > { %377 = vmatprep.subr.mxu0 %v292_v56  ;;  %576 = vmatprep.subr.mxu1 %v292_v56 }
  0x82   : > { %378 = vmatpush2.msra.mxu0 %v291_v57  ;;  %608 = vmatpush2.msra.mxu1 %v291_v57 }
  0x83   : > { %379 = vmatprep.subr.mxu0 %v290_v58  ;;  %577 = vmatprep.subr.mxu1 %v290_v58 }
  0x84   : > { %380 = vmatpush2.msra.mxu0 %v289_v59  ;;  %609 = vmatpush2.msra.mxu1 %v289_v59 }
  0x85   : > { %381 = vmatprep.subr.mxu0 %v288_v60  ;;  %578 = vmatprep.subr.mxu1 %v288_v60 }
  0x86   : > { %382 = vmatpush2.msra.mxu0 %v287_v61  ;;  %610 = vmatpush2.msra.mxu1 %v287_v61 }
  0x87   : > { %383 = vmatprep.subr.mxu0 %v286_v62  ;;  %579 = vmatprep.subr.mxu1 %v286_v62 }
  0x88   : > { %384 = vmatpush2.msra.mxu0 %v285_v63  ;;  %611 = vmatpush2.msra.mxu1 %v285_v63 }
  0x89   : > { %385 = vmatprep.mubr.f32.mxu0 %v250_v0  ;;  %391 = vmatprep.mubr.f32.mxu1 %v252_v1 }
  0x8a   : > { %386 = vmatmul.mubr.f32.vlgmr.msra.gmra.mxu0 %v249_v2  ;;  %392 = vmatmul.mubr.f32.vlgmr.msra.gmra.mxu1 %v251_v3 }
 0x14a   : > { %v387_v6 = vpop.f32.mrf.mxu0  ;;  %v393_v7 = vpop.f32.mrf.mxu1 }
 0x14b   : > { %v388_v10 = vadd.f32 %v387_v6, %v317_v4  ;;  %v394_v11 = vadd.f32 %v393_v7, %v319_v5 }
 0x14c   : > { %v389_v12 = vpop.f32.mrf.mxu0  ;;  %v395_v13 = vpop.f32.mrf.mxu1 }
 0x14d   : > { %398 = vst [vmem:[%s245_s20] sm:$0xff] %v388_v10  ;;  %400 = vst [vmem:[%s245_s20 + $0x10] sm:$0xff] %v394_v11  ;;  %v390_v14 = vadd.f32 %v389_v12, %v318_v8  ;;  %v396_v15 = vadd.f32 %v395_v13, %v320_v9 }
 0x14f   : > { %399 = vst [vmem:[%s245_s20 + $0x8] sm:$0xff] %v390_v14  ;;  %401 = vst [vmem:[%s245_s20 + $0x18] sm:$0xff] %v396_v15 }
 0x150   : > { %792 = shalt.err (!%p789_p2)
}
 0x151   : > { %s793_s18 = scalar_lea.hbm %s1052_s8, 512  ;;  %s797_s4 = scalar_lea.hbm %s1103_s3, 1024 }
 0x152   : > { %p794_p9 = scmp.ne.s32.totalorder %s1052_s8, %s793_s18  ;;  %p798_p0 = scmp.lt.s32.totalorder %s1052_s8, %s1103_s3 }
 0x153   : > { %p799_p7 = scmp.lt.s32.totalorder %s797_s4, %s793_s18 }
 0x154   : > { %p795_p12 = pnand %p794_p9, %p994_p3 }
 0x155   : > { %p800_p5 = por %p799_p7, %p798_p0 }
 0x156   : > { %p796_p13 = pneg %p795_p12 }
 0x158   : > { %p801_p1 = pnand %p800_p5, %p796_p13 }
 0x15a   : > { %804 = shalt.err (!%p801_p1)
}
 0x15b   : > { %s871_s20 = smov 256   ;;  %s872_s24 = smov 16  }
 0x15c   : > { %622 = dma.vmem_to_hbm [thread:$0]  (%p994_p3), %s1047_s22, 512, %s1052_s8, %s403_s15, %s871_s20, %s871_s20, %s872_s24  }
 0x15d PF: > { %s434_s5 = sand.u32 1, %s843_s12   ;;  %p1114_p4 = scmp.ne.s32.totalorder %s1108_s23, 0 }
 0x15e   : > { %p1115_p6 = scmp.ge.s32.totalorder %s863_s17, 2  ;;  %s435_s7 = scalar_lea.sflag [#allocation4], %s434_s5 }
 0x160   : > { %p636_p8 = pnand %p1115_p6, %p1114_p4 }
 0x162   : > { %p637_p10 = pneg %p636_p8 }
 0x164   : > { %838 = dma.done.wait (%p637_p10), %s435_s7, 512  }
 0x165   : > { %840 = vsyncadd (%p637_p10), %s435_s7, 4294966784  ;;  %s20_s17 = sadd.s32 1, %s863_s17   ;;  %s1116_s12 = smov %s847_s13 }
 0x166   : > { %p17_p11 = scmp.ge.s32.totalorder %s20_s17, 4   ;;  %s1117_s13 = smov %s851_s14 }
 0x167   : > { %s1118_s14 = smov %s1003_s29  ;;  %s1119_s15 = smov %s859_s16 }
 0x168   : > { %s1120_s16 = smov %s1122_s11  ;;  %19 = sbr.rel (!%p17_p11) target bundleno = 7 (0x7), region = 86 }
 0x16d   :  { %440 = vsyncpa [#allocation3], 1 }
 0x16e   :  { %442 = vsyncpa [#allocation3 + $0x1], 1 }
 0x16f   :  { %443 = vsyncpa [#allocation6], 1 }
 0x170   :  { %444 = vsyncpa [#allocation4], 1 }
 0x171   :  { %446 = vsyncpa [#allocation4 + $0x1], 1 }

</bundles_post_ra>
